<compile_context>
chip_gen: v6e
topology: v6e:2x2x1
jax: 0.10.0
libtpu: 0.0.40
codegen_flags: <defaults>
</compile_context>

<pallas_src>
import functools

import jax
import jax.numpy as jnp
from jax.experimental import pallas as pl
from jax.experimental.pallas import tpu as pltpu

_LANES = 128            # lane width of a vreg
_IN = 2
_OUT = 2
_PER_ROW = _LANES // _IN          # 64 batch elements per 128-lane row
_DEFAULT_TILE_ROWS = 1024         # (1024, 128) f32 block = 512 KiB per buffer


def _round_up(n, m):
    return ((n + m - 1) // m) * m


def _linear2x2_kernel(x_ref, a_ref, ce_ref, co_ref, b_ref, o_ref):
    # x_ref/o_ref: (TILE_ROWS, 128), lane-interleaved [x0, x1, x0, x1, ...]
    # a/ce/co/b:   (1, 128) coefficient vectors (broadcast over sublanes):
    #   a  = [w00, w11, w00, w11, ...]  (coefficient for v itself)
    #   ce = [w01,   0, w01,   0, ...]  (coefficient for the left-neighbour)
    #   co = [  0, w10,   0, w10, ...]  (coefficient for the right-neighbour)
    #   b  = [ b0,  b1,  b0,  b1, ...]
    v = x_ref[...]
    # lane i <- lane i+1 (x1 of the same batch element, seen from even lanes)
    v_left = pltpu.roll(v, shift=_LANES - 1, axis=1)
    # lane i <- lane i-1 (x0 of the same batch element, seen from odd lanes)
    v_right = pltpu.roll(v, shift=1, axis=1)
    # Roll wrap-around lanes are multiplied by zero coefficients, so no mask
    # or select is needed.  3 muls + 3 adds on the VPU, rolls on the XLU.
    out = (a_ref[...] * v
           + ce_ref[...] * v_left
           + co_ref[...] * v_right
           + b_ref[...])
    o_ref[...] = out.astype(o_ref.dtype)


@functools.partial(jax.jit, static_argnames=("max_tile_rows",))
def linear_pallas(x, weight, bias, *, max_tile_rows=_DEFAULT_TILE_ROWS):
    """y = x @ weight.T + bias (nn.Linear(2, 2)) as a batch-tiled Pallas kernel.

    weight is in PyTorch layout [OUT, IN] = [2, 2]; bias is [2].
    """
    B, in_f = x.shape
    out_f = weight.shape[0]
    assert in_f == _IN and out_f == _OUT, "kernel is specialized to Linear(2, 2)"
    assert max_tile_rows % 8 == 0

    dt = x.dtype
    w = weight.astype(dt)
    b = bias.astype(dt)

    # ---- lane-dense view of the batch -------------------------------------
    rows_needed = pl.cdiv(B, _PER_ROW)
    if rows_needed <= max_tile_rows:
        tile_rows = _round_up(rows_needed, 8)       # sublane-aligned block
        grid_rows = 1
    else:
        tile_rows = max_tile_rows
        grid_rows = pl.cdiv(rows_needed, tile_rows)
    rows = grid_rows * tile_rows
    b_padded = rows * _PER_ROW
    if b_padded != B:
        x = jnp.pad(x, ((0, b_padded - B), (0, 0)))
    # Free contiguous view: (Bp, 2) -> (rows, 128); features interleaved on
    # the lane axis, batch on the (tiled) sublane/row axis.
    x_flat = x.reshape(rows, _LANES)

    # ---- interleaved coefficient vectors (tiny one-time prep, fused by jit)
    zero = jnp.zeros((), dt)
    a_vec = jnp.tile(jnp.stack([w[0, 0], w[1, 1]]), _PER_ROW).reshape(1, _LANES)
    ce_vec = jnp.tile(jnp.stack([w[0, 1], zero]), _PER_ROW).reshape(1, _LANES)
    co_vec = jnp.tile(jnp.stack([zero, w[1, 0]]), _PER_ROW).reshape(1, _LANES)
    b_vec = jnp.tile(b, _PER_ROW).reshape(1, _LANES)

    out_flat = pl.pallas_call(
        _linear2x2_kernel,
        out_shape=jax.ShapeDtypeStruct((rows, _LANES), dt),
        grid=(grid_rows,),
        in_specs=[
            pl.BlockSpec((tile_rows, _LANES), lambda i: (i, 0)),   # x tiles
            pl.BlockSpec((1, _LANES), lambda i: (0, 0)),           # a  (const)
            pl.BlockSpec((1, _LANES), lambda i: (0, 0)),           # ce (const)
            pl.BlockSpec((1, _LANES), lambda i: (0, 0)),           # co (const)
            pl.BlockSpec((1, _LANES), lambda i: (0, 0)),           # b  (const)
        ],
        out_specs=pl.BlockSpec((tile_rows, _LANES), lambda i: (i, 0)),
        compiler_params=pltpu.CompilerParams(
            # Batch axis is embarrassingly parallel -> shard across v7x's 2 TCs.
            dimension_semantics=("parallel",),
            # ~2 MiB actually needed (double-buffered in + out tiles); stay
            # well under v5e's 16 MiB scoped default and v7x's 64 MiB VMEM.
            vmem_limit_bytes=8 * 1024 * 1024,
        ),
    )(x_flat, a_vec, ce_vec, co_vec, b_vec)

    y = out_flat.reshape(b_padded, _OUT)
    if b_padded != B:
        y = y[:B]
    return y


# This op moves B*(IN+OUT)*4 bytes and does ~4 FLOPs per output element: it is
# purely memory-bound.  Below ~1 MiB of HBM traffic the pallas_call dispatch /
# DMA bookkeeping dwarfs the transfer time, so route tiny shapes to fused XLA.
_PALLAS_MIN_BYTES = 1 << 20


@jax.jit
def linear(x, weight, bias):
    """nn.Linear forward with a bandwidth-based size gate."""
    B, in_f = x.shape
    out_f = weight.shape[0]
    traffic_bytes = B * (in_f + out_f) * x.dtype.itemsize
    if in_f != _IN or out_f != _OUT or traffic_bytes < _PALLAS_MIN_BYTES:
        # Tiny or non-2x2 shapes: fused XLA matmul.
        return x @ weight.T + bias
    return linear_pallas(x, weight, bias)


if __name__ == "__main__":
    key = jax.random.PRNGKey(0)
    k_x, k_w, k_b, k_x2 = jax.random.split(key, 4)

    IN_FEATURES = 2
    OUT_FEATURES = 2
    BATCH = 8

    # Deterministic parameter init mimicking PyTorch nn.Linear default:
    # U(-1/sqrt(in_features), 1/sqrt(in_features))
    bound = 1.0 / (IN_FEATURES ** 0.5)
    weight = jax.random.uniform(
        k_w, (OUT_FEATURES, IN_FEATURES), jnp.float32, -bound, bound
    )
    bias = jax.random.uniform(k_b, (OUT_FEATURES,), jnp.float32, -bound, bound)

    x = jax.random.normal(k_x, (BATCH, IN_FEATURES), jnp.float32)

    # Small-shape run of the Pallas kernel itself (single-tile grid).
    out = jax.block_until_ready(linear_pallas(x, weight, bias))
    ref = x @ weight.T + bias
    assert out.shape == (BATCH, OUT_FEATURES)
    assert jnp.allclose(out, ref, atol=1e-5, rtol=1e-5)

    # Exercise the batch-tiled, multi-step grid path (grid = 4) with a small
    # tile override, still at a modest total size.
    x2 = jax.random.normal(k_x2, (8192, IN_FEATURES), jnp.float32)
    out2 = jax.block_until_ready(linear_pallas(x2, weight, bias, max_tile_rows=32))
    ref2 = x2 @ weight.T + bias
    assert jnp.allclose(out2, ref2, atol=1e-5, rtol=1e-5)

    # Size-gated wrapper (routes this tiny shape to XLA) must agree too.
    gated = jax.block_until_ready(linear(x, weight, bias))
    assert jnp.allclose(gated, ref, atol=1e-5, rtol=1e-5)

    print("KERNEL_OK")
</pallas_src>

<mosaic_0001>
module attributes {stable_mosaic.version = 11 : i64} {
  func.func @_linear2x2_kernel(%arg0: i32, %arg1: memref<8x128xf32, #tpu.memory_space<vmem>>, %arg2: memref<1x128xf32, #tpu.memory_space<vmem>>, %arg3: memref<1x128xf32, #tpu.memory_space<vmem>>, %arg4: memref<1x128xf32, #tpu.memory_space<vmem>>, %arg5: memref<1x128xf32, #tpu.memory_space<vmem>>, %arg6: memref<8x128xf32, #tpu.memory_space<vmem>>) attributes {dimension_semantics = [#tpu.dimension_semantics<parallel>], iteration_bounds = array<i64: 1>, scalar_prefetch = 0 : i64, scratch_operands = 0 : i64, tpu.core_type = #tpu.core_type<tc>, window_params = [{transform_indices = @transform_0, window_bounds = array<i64: 8, 128>}, {pipeline_mode = #tpu.pipeline_mode<synchronous>, transform_indices = @transform_1, window_bounds = array<i64: 1, 128>}, {pipeline_mode = #tpu.pipeline_mode<synchronous>, transform_indices = @transform_2, window_bounds = array<i64: 1, 128>}, {pipeline_mode = #tpu.pipeline_mode<synchronous>, transform_indices = @transform_3, window_bounds = array<i64: 1, 128>}, {pipeline_mode = #tpu.pipeline_mode<synchronous>, transform_indices = @transform_4, window_bounds = array<i64: 1, 128>}, {transform_indices = @transform_5, window_bounds = array<i64: 8, 128>}]} {
    %c0 = arith.constant 0 : index
    %c0_0 = arith.constant 0 : index
    %0 = vector.load %arg1[%c0, %c0_0] : memref<8x128xf32, #tpu.memory_space<vmem>>, vector<8x128xf32>
    %c127_i32 = arith.constant 127 : i32
    %1 = tpu.dynamic_rotate %0 by %c127_i32 dim 1 : vector<8x128xf32>, i32 -> vector<8x128xf32>
    %c1_i32 = arith.constant 1 : i32
    %2 = tpu.dynamic_rotate %0 by %c1_i32 dim 1 : vector<8x128xf32>, i32 -> vector<8x128xf32>
    %c0_1 = arith.constant 0 : index
    %c0_2 = arith.constant 0 : index
    %3 = vector.load %arg2[%c0_1, %c0_2] : memref<1x128xf32, #tpu.memory_space<vmem>>, vector<1x128xf32>
    %4 = vector.broadcast %3 : vector<1x128xf32> to vector<8x128xf32>
    %5 = arith.mulf %4, %0 : vector<8x128xf32>
    %c0_3 = arith.constant 0 : index
    %c0_4 = arith.constant 0 : index
    %6 = vector.load %arg3[%c0_3, %c0_4] : memref<1x128xf32, #tpu.memory_space<vmem>>, vector<1x128xf32>
    %7 = vector.broadcast %6 : vector<1x128xf32> to vector<8x128xf32>
    %8 = arith.mulf %7, %1 : vector<8x128xf32>
    %9 = arith.addf %5, %8 : vector<8x128xf32>
    %c0_5 = arith.constant 0 : index
    %c0_6 = arith.constant 0 : index
    %10 = vector.load %arg4[%c0_5, %c0_6] : memref<1x128xf32, #tpu.memory_space<vmem>>, vector<1x128xf32>
    %11 = vector.broadcast %10 : vector<1x128xf32> to vector<8x128xf32>
    %12 = arith.mulf %11, %2 : vector<8x128xf32>
    %13 = arith.addf %9, %12 : vector<8x128xf32>
    %c0_7 = arith.constant 0 : index
    %c0_8 = arith.constant 0 : index
    %14 = vector.load %arg5[%c0_7, %c0_8] : memref<1x128xf32, #tpu.memory_space<vmem>>, vector<1x128xf32>
    %15 = vector.broadcast %14 : vector<1x128xf32> to vector<8x128xf32>
    %16 = arith.addf %13, %15 : vector<8x128xf32>
    %c0_9 = arith.constant 0 : index
    %c0_10 = arith.constant 0 : index
    %17 = vector.load %arg6[%c0_9, %c0_10] : memref<8x128xf32, #tpu.memory_space<vmem>>, vector<8x128xf32>
    tpu.vector_store %arg6[%c0_9, %c0_10], %16 {strides = array<i32>} : memref<8x128xf32, #tpu.memory_space<vmem>>, vector<8x128xf32>,
    return
  }
  func.func @transform_0(%arg0: i32) -> (i32, i32) {
    %c0_i32 = arith.constant 0 : i32
    %c0_i32_0 = arith.constant 0 : i32
    return %arg0, %c0_i32 : i32, i32
  }
  func.func @transform_1(%arg0: i32) -> (i32, i32) {
    %c0_i32 = arith.constant 0 : i32
    %c0_i32_0 = arith.constant 0 : i32
    %c0_i32_1 = arith.constant 0 : i32
    return %c0_i32, %c0_i32_0 : i32, i32
  }
  func.func @transform_2(%arg0: i32) -> (i32, i32) {
    %c0_i32 = arith.constant 0 : i32
    %c0_i32_0 = arith.constant 0 : i32
    %c0_i32_1 = arith.constant 0 : i32
    return %c0_i32, %c0_i32_0 : i32, i32
  }
  func.func @transform_3(%arg0: i32) -> (i32, i32) {
    %c0_i32 = arith.constant 0 : i32
    %c0_i32_0 = arith.constant 0 : i32
    %c0_i32_1 = arith.constant 0 : i32
    return %c0_i32, %c0_i32_0 : i32, i32
  }
  func.func @transform_4(%arg0: i32) -> (i32, i32) {
    %c0_i32 = arith.constant 0 : i32
    %c0_i32_0 = arith.constant 0 : i32
    %c0_i32_1 = arith.constant 0 : i32
    return %c0_i32, %c0_i32_0 : i32, i32
  }
  func.func @transform_5(%arg0: i32) -> (i32, i32) {
    %c0_i32 = arith.constant 0 : i32
    %c0_i32_0 = arith.constant 0 : i32
    return %arg0, %c0_i32 : i32, i32
  }
}

</mosaic_0001>

<bundles_post_ra>
// kernel: tile.23
= control target key start
LH: loop header
LB: loop body
LE: loop exit
PB: predicated region body
PF: predicated region fallthrough
CT: control target
= control target key end

     0   :  { %s64_s0 = inlined_call_operand.vmem [shape: f32[2], index: 0, kind: input, shape index: {}]   ;;  %s65_s1 = inlined_call_operand.vmem [shape: f32[64,2], index: 1, kind: output, shape index: {}]  }
   0x1   :  { %v4_v0 = vld [vmem:[%s64_s0] ss:$0 sm:$0xff] }
   0x2   :  { %5 = vst [vmem:[%s65_s1] sm:$0xff] %v4_v0  ;;  %20 = vst [vmem:[%s65_s1 + $0x8] sm:$0xff] %v4_v0 }
   0x3   :  { %21 = vst [vmem:[%s65_s1 + $0x10] sm:$0xff] %v4_v0  ;;  %22 = vst [vmem:[%s65_s1 + $0x18] sm:$0xff] %v4_v0 }
   0x4   :  { %23 = vst [vmem:[%s65_s1 + $0x20] sm:$0xff] %v4_v0  ;;  %24 = vst [vmem:[%s65_s1 + $0x28] sm:$0xff] %v4_v0 }
   0x5   :  { %25 = vst [vmem:[%s65_s1 + $0x30] sm:$0xff] %v4_v0  ;;  %26 = vst [vmem:[%s65_s1 + $0x38] sm:$0xff] %v4_v0 }

// kernel: tile.24
= control target key start
LH: loop header
LB: loop body
LE: loop exit
PB: predicated region body
PF: predicated region fallthrough
CT: control target
= control target key end

     0   :  { %s517_s10 = smov 126   ;;  %s518_s11 = smov 122   ;;  %vm3_vm0 = vcmask 15360   ;;  %vm9_vm1 = vcmask 1048560   ;;  %vm21_vm2 = vcmask 1015760   ;;  %vm15_vm3 = vcmask 1032160   ;;  %s785_s0 = inlined_call_operand.vmem [shape: f32[64,2], index: 0, kind: input, shape index: {}]   ;;  %s786_s1 = inlined_call_operand.vmem [shape: f32[1,128], index: 1, kind: output, shape index: {}]  }
   0x1   :  { %v391_v0 = vld [vmem:[%s785_s0 + $0x3f] sm:$0x1]   ;;  %v393_v1 = vld [vmem:[%s785_s0 + $0x3d] sm:$0x1]   ;;  %v392_v2 = vld [vmem:[%s785_s0 + $0x3e] sm:$0x1]  }
   0x2   :  { %7 = vrot.lane.b32.xlu0 %v391_v0, %s517_s10  ;;  %19 = vrot.lane.b32.xlu1 %v393_v1, %s518_s11  ;;  %v394_v3 = vld [vmem:[%s785_s0 + $0x3c] sm:$0x1]   ;;  %s519_s16 = smov 124   ;;  %s520_s17 = smov 120   ;;  %v395_v4 = vld [vmem:[%s785_s0 + $0x3b] sm:$0x1]  }
   0x3   :  { %v396_v5 = vld [vmem:[%s785_s0 + $0x3a] sm:$0x1]   ;;  %s521_s22 = smov 118   ;;  %s522_s23 = smov 116   ;;  %v397_v6 = vld [vmem:[%s785_s0 + $0x39] sm:$0x1]  }
   0x4   :  { %v398_v7 = vld [vmem:[%s785_s0 + $0x38] sm:$0x1]   ;;  %s523_s28 = smov 114   ;;  %s524_s29 = smov 112   ;;  %v399_v8 = vld [vmem:[%s785_s0 + $0x37] sm:$0x1]  }
   0x5   :  { %v400_v9 = vld [vmem:[%s785_s0 + $0x36] sm:$0x1]   ;;  %s525_s5 = smov 110   ;;  %s526_s6 = smov 108   ;;  %v401_v10 = vld [vmem:[%s785_s0 + $0x35] sm:$0x1]  }
   0x6   :  { %13 = vrot.lane.b32.xlu0 %v392_v2, %s519_s16  ;;  %25 = vrot.lane.b32.xlu1 %v394_v3, %s520_s17  ;;  %v402_v11 = vld [vmem:[%s785_s0 + $0x34] sm:$0x1]   ;;  %s527_s11 = smov 106   ;;  %s528_s12 = smov 104   ;;  %v403_v12 = vld [vmem:[%s785_s0 + $0x33] sm:$0x1]  }
   0x7   :  { %v404_v13 = vld [vmem:[%s785_s0 + $0x32] sm:$0x1]   ;;  %s529_s17 = smov 102   ;;  %s530_s18 = smov 100   ;;  %v405_v14 = vld [vmem:[%s785_s0 + $0x31] sm:$0x1]  }
   0x8   :  { %v406_v15 = vld [vmem:[%s785_s0 + $0x30] sm:$0x1]   ;;  %v2_v16 = vld [vmem:[%s785_s0] sm:$0x1]   ;;  %s531_s25 = smov 98   ;;  %s532_s26 = smov 96  }
   0x9   :  { %v407_v17 = vld [vmem:[%s785_s0 + $0x2f] sm:$0x1]   ;;  %v408_v18 = vld [vmem:[%s785_s0 + $0x2e] sm:$0x1]   ;;  %4 = vst.msk [vmem:[#allocation0] sm:$0x1] %vm3_vm0, %v2_v16  }
   0xa   :  { %31 = vrot.lane.b32.xlu0 %v395_v4, %s521_s22  ;;  %37 = vrot.lane.b32.xlu1 %v396_v5, %s522_s23  ;;  %s533_s2 = smov 94   ;;  %s534_s3 = smov 92   ;;  %v409_v19 = vld [vmem:[%s785_s0 + $0x2d] sm:$0x1]   ;;  %v410_v20 = vld [vmem:[%s785_s0 + $0x2c] sm:$0x1]  }
   0xb   :  { %s535_s8 = smov 90   ;;  %s536_s9 = smov 88   ;;  %v411_v21 = vld [vmem:[%s785_s0 + $0x2b] sm:$0x1]   ;;  %v412_v22 = vld [vmem:[%s785_s0 + $0x2a] sm:$0x1]  }
   0xc   :  { %s537_s14 = smov 86   ;;  %s538_s15 = smov 84   ;;  %v413_v23 = vld [vmem:[%s785_s0 + $0x29] sm:$0x1]   ;;  %v414_v24 = vld [vmem:[%s785_s0 + $0x28] sm:$0x1]  }
   0xd   :  { %s539_s20 = smov 82   ;;  %s540_s21 = smov 80   ;;  %v415_v25 = vld [vmem:[%s785_s0 + $0x27] sm:$0x1]   ;;  %v416_v26 = vld [vmem:[%s785_s0 + $0x26] sm:$0x1]  }
   0xe   :  { %43 = vrot.lane.b32.xlu0 %v397_v6, %s523_s28  ;;  %49 = vrot.lane.b32.xlu1 %v398_v7, %s524_s29  ;;  %s542_s27 = smov 76   ;;  %v417_v27 = vld [vmem:[%s785_s0 + $0x25] sm:$0x1]   ;;  %v418_v28 = vld [vmem:[%s785_s0 + $0x24] sm:$0x1]   ;;  %s544_s4 = smov 72  }
   0xf   :  { %v419_v29 = vld [vmem:[%s785_s0 + $0x23] sm:$0x1]   ;;  %v420_v30 = vld [vmem:[%s785_s0 + $0x22] sm:$0x1]   ;;  %s546_s10 = smov 68   ;;  %s548_s16 = smov 64  }
  0x10   :  { %v421_v31 = vld [vmem:[%s785_s0 + $0x21] sm:$0x1]   ;;  %v422_v32 = vld [vmem:[%s785_s0 + $0x20] sm:$0x1]   ;;  %v423_v33 = vld [vmem:[%s785_s0 + $0x1f] sm:$0x1]  }
  0x11   :  { %v424_v34 = vld [vmem:[%s785_s0 + $0x1e] sm:$0x1]   ;;  %s550_s22 = smov 60   ;;  %v425_v35 = vld [vmem:[%s785_s0 + $0x1d] sm:$0x1]   ;;  %s552_s28 = smov 56  }
  0x12   :  { %55 = vrot.lane.b32.xlu0 %v399_v8, %s525_s5  ;;  %61 = vrot.lane.b32.xlu1 %v400_v9, %s526_s6  ;;  %v426_v36 = vld [vmem:[%s785_s0 + $0x1c] sm:$0x1]   ;;  %v427_v37 = vld [vmem:[%s785_s0 + $0x1b] sm:$0x1]   ;;  %s554_s5 = smov 52   ;;  %s560_s23 = smov 40  }
  0x13   :  { %v428_v38 = vld [vmem:[%s785_s0 + $0x1a] sm:$0x1]   ;;  %v429_v39 = vld [vmem:[%s785_s0 + $0x19] sm:$0x1]   ;;  %v430_v40 = vld [vmem:[%s785_s0 + $0x18] sm:$0x1]  }
  0x14   :  { %v431_v41 = vld [vmem:[%s785_s0 + $0x17] sm:$0x1]   ;;  %v432_v42 = vld [vmem:[%s785_s0 + $0x16] sm:$0x1]   ;;  %v433_v43 = vld [vmem:[%s785_s0 + $0x15] sm:$0x1]  }
  0x15   :  { %v434_v44 = vld [vmem:[%s785_s0 + $0x14] sm:$0x1]   ;;  %v435_v45 = vld [vmem:[%s785_s0 + $0x13] sm:$0x1]   ;;  %v436_v46 = vld [vmem:[%s785_s0 + $0x12] sm:$0x1]  }
  0x16   :  { %67 = vrot.lane.b32.xlu0 %v401_v10, %s527_s11  ;;  %73 = vrot.lane.b32.xlu1 %v402_v11, %s528_s12  ;;  %s556_s11 = smov 48   ;;  %s562_s29 = smov 36   ;;  %v437_v47 = vld [vmem:[%s785_s0 + $0x11] sm:$0x1]   ;;  %v438_v48 = vld [vmem:[%s785_s0 + $0x10] sm:$0x1]  }
  0x17   :  { %s564_s6 = smov 32   ;;  %v439_v49 = vld [vmem:[%s785_s0 + $0xf] sm:$0x1]   ;;  %v440_v50 = vld [vmem:[%s785_s0 + $0xe] sm:$0x1]   ;;  %s566_s12 = smov 28  }
  0x18   :  { %v441_v51 = vld [vmem:[%s785_s0 + $0xd] sm:$0x1]   ;;  %v442_v52 = vld [vmem:[%s785_s0 + $0xc] sm:$0x1]   ;;  %v443_v53 = vld [vmem:[%s785_s0 + $0xb] sm:$0x1]  }
  0x19   :  { %v444_v54 = vld [vmem:[%s785_s0 + $0xa] sm:$0x1]   ;;  %s570_s24 = smov 20   ;;  %v445_v55 = vld [vmem:[%s785_s0 + $0x9] sm:$0x1]   ;;  %s572_s30 = smov 16  }
  0x1a   :  { %79 = vrot.lane.b32.xlu0 %v403_v12, %s529_s17  ;;  %85 = vrot.lane.b32.xlu1 %v404_v13, %s530_s18  ;;  %s558_s17 = smov 44   ;;  %s568_s18 = smov 24   ;;  %v446_v56 = vld [vmem:[%s785_s0 + $0x8] sm:$0x1]   ;;  %v447_v57 = vld [vmem:[%s785_s0 + $0x7] sm:$0x1]  }
  0x1b   :  { %v448_v58 = vld [vmem:[%s785_s0 + $0x6] sm:$0x1]   ;;  %s574_s7 = smov 12   ;;  %v449_v59 = vld [vmem:[%s785_s0 + $0x5] sm:$0x1]   ;;  %s576_s13 = smov 8  }
  0x1c   :  { %v450_v60 = vld [vmem:[%s785_s0 + $0x4] sm:$0x1]   ;;  %v451_v63 = vld [vmem:[%s785_s0 + $0x3] sm:$0x1]   ;;  %v452_v0 = vld [vmem:[%s785_s0 + $0x2] sm:$0x1]  }
  0x1d   :  { %vm27_vm4 = vcmask 999360   ;;  %vm33_vm5 = vcmask 982960   ;;  %s578_s19 = smov 4   ;;  %v453_v3 = vld [vmem:[%s785_s0 + $0x1] sm:$0x1]   ;;  %vm39_vm6 = vcmask 966560  }
  0x1e   :  { %91 = vrot.lane.b32.xlu0 %v405_v14, %s531_s25  ;;  %97 = vrot.lane.b32.xlu1 %v406_v15, %s532_s26  ;;  %s541_s26 = smov 78   ;;  %s579_s0 = smov 2   ;;  %vm45_vm7 = vcmask 950160   ;;  %vm51_vm8 = vcmask 933760   ;;  %vm57_vm9 = vcmask 917360   ;;  %vm63_vm10 = vcmask 900960  }
  0x1f   :  { %vm69_vm11 = vcmask 884560   ;;  %vm75_vm12 = vcmask 868160   ;;  %vm81_vm13 = vcmask 851760   ;;  %vm87_vm14 = vcmask 835360  }
  0x20   :  { %vm93_vm15 = vcmask 818960   ;;  %vm99_vm0 = vcmask 802560  }
  0x22   :  { %103 = vrot.lane.b32.xlu0 %v407_v17, %s533_s2  ;;  %109 = vrot.lane.b32.xlu1 %v408_v18, %s534_s3  ;;  %s543_s3 = smov 74  }
  0x26   :  { %115 = vrot.lane.b32.xlu0 %v409_v19, %s535_s8  ;;  %121 = vrot.lane.b32.xlu1 %v410_v20, %s536_s9  ;;  %s545_s9 = smov 70  }
  0x2a   :  { %127 = vrot.lane.b32.xlu0 %v411_v21, %s537_s14  ;;  %133 = vrot.lane.b32.xlu1 %v412_v22, %s538_s15  ;;  %s547_s15 = smov 66  }
  0x2e   :  { %139 = vrot.lane.b32.xlu0 %v413_v23, %s539_s20  ;;  %145 = vrot.lane.b32.xlu1 %v414_v24, %s540_s21  ;;  %s549_s21 = smov 62  }
  0x32   :  { %151 = vrot.lane.b32.xlu0 %v415_v25, %s541_s26  ;;  %157 = vrot.lane.b32.xlu1 %v416_v26, %s542_s27  ;;  %s551_s27 = smov 58  }
  0x36   :  { %163 = vrot.lane.b32.xlu0 %v417_v27, %s543_s3  ;;  %169 = vrot.lane.b32.xlu1 %v418_v28, %s544_s4  ;;  %s553_s4 = smov 54  }
  0x3a   :  { %175 = vrot.lane.b32.xlu0 %v419_v29, %s545_s9  ;;  %181 = vrot.lane.b32.xlu1 %v420_v30, %s546_s10  ;;  %s555_s10 = smov 50  }
  0x3e   :  { %187 = vrot.lane.b32.xlu0 %v421_v31, %s547_s15  ;;  %193 = vrot.lane.b32.xlu1 %v422_v32, %s548_s16  ;;  %s557_s16 = smov 46  }
  0x42   :  { %199 = vrot.lane.b32.xlu0 %v423_v33, %s549_s21  ;;  %205 = vrot.lane.b32.xlu1 %v424_v34, %s550_s22  ;;  %s559_s22 = smov 42  }
  0x46   :  { %211 = vrot.lane.b32.xlu0 %v425_v35, %s551_s27  ;;  %217 = vrot.lane.b32.xlu1 %v426_v36, %s552_s28  ;;  %s561_s28 = smov 38  }
  0x4a   :  { %223 = vrot.lane.b32.xlu0 %v427_v37, %s553_s4  ;;  %229 = vrot.lane.b32.xlu1 %v428_v38, %s554_s5  ;;  %s563_s5 = smov 34  }
  0x4e   :  { %235 = vrot.lane.b32.xlu0 %v429_v39, %s555_s10  ;;  %241 = vrot.lane.b32.xlu1 %v430_v40, %s556_s11  ;;  %s565_s11 = smov 30  }
  0x52   :  { %247 = vrot.lane.b32.xlu0 %v431_v41, %s557_s16  ;;  %253 = vrot.lane.b32.xlu1 %v432_v42, %s558_s17  ;;  %s567_s17 = smov 26  }
  0x56   :  { %259 = vrot.lane.b32.xlu0 %v433_v43, %s559_s22  ;;  %265 = vrot.lane.b32.xlu1 %v434_v44, %s560_s23  ;;  %s569_s23 = smov 22  }
  0x5a   :  { %271 = vrot.lane.b32.xlu0 %v435_v45, %s561_s28  ;;  %277 = vrot.lane.b32.xlu1 %v436_v46, %s562_s29  ;;  %s571_s29 = smov 18  }
  0x5e   :  { %283 = vrot.lane.b32.xlu0 %v437_v47, %s563_s5  ;;  %289 = vrot.lane.b32.xlu1 %v438_v48, %s564_s6  ;;  %s573_s6 = smov 14  }
  0x62   :  { %295 = vrot.lane.b32.xlu0 %v439_v49, %s565_s11  ;;  %301 = vrot.lane.b32.xlu1 %v440_v50, %s566_s12  ;;  %s575_s12 = smov 10  }
  0x66   :  { %307 = vrot.lane.b32.xlu0 %v441_v51, %s567_s17  ;;  %313 = vrot.lane.b32.xlu1 %v442_v52, %s568_s18  ;;  %s577_s18 = smov 6  }
  0x6a   :  { %319 = vrot.lane.b32.xlu0 %v443_v53, %s569_s23  ;;  %325 = vrot.lane.b32.xlu1 %v444_v54, %s570_s24 }
  0x6e   :  { %331 = vrot.lane.b32.xlu0 %v445_v55, %s571_s29  ;;  %337 = vrot.lane.b32.xlu1 %v446_v56, %s572_s30 }
  0x72   :  { %343 = vrot.lane.b32.xlu0 %v447_v57, %s573_s6  ;;  %349 = vrot.lane.b32.xlu1 %v448_v58, %s574_s7 }
  0x74   :  { %v8_v61 = vpop.permute.xlu0 %7   ;;  %v20_v62 = vpop.permute.xlu1 %19  }
  0x75   :  { %10 = vst.msk [vmem:[#allocation0] sm:$0x1] %vm9_vm1, %v8_v61   ;;  %vm105_vm1 = vcmask 786160  }
  0x76   :  { %355 = vrot.lane.b32.xlu0 %v449_v59, %s575_s12  ;;  %361 = vrot.lane.b32.xlu1 %v450_v60, %s576_s13 }
  0x78   :  { %v14_v1 = vpop.permute.xlu0 %13   ;;  %v26_v2 = vpop.permute.xlu1 %25  }
  0x79   :  { %16 = vst.msk [vmem:[#allocation0] sm:$0x1] %vm15_vm3, %v14_v1   ;;  %vm117_vm3 = vcmask 753360  }
  0x7a   :  { %22 = vst.msk [vmem:[#allocation0] sm:$0x1] %vm21_vm2, %v20_v62   ;;  %367 = vrot.lane.b32.xlu0 %v451_v63, %s577_s18  ;;  %373 = vrot.lane.b32.xlu1 %v452_v0, %s578_s19  ;;  %vm111_vm2 = vcmask 769760  }
  0x7b   :  { %28 = vst.msk [vmem:[#allocation0] sm:$0x1] %vm27_vm4, %v26_v2   ;;  %vm123_vm4 = vcmask 736960  }
  0x7c   :  { %v32_v4 = vpop.permute.xlu0 %31   ;;  %v38_v5 = vpop.permute.xlu1 %37  }
  0x7d   :  { %34 = vst.msk [vmem:[#allocation0] sm:$0x1] %vm33_vm5, %v32_v4   ;;  %vm129_vm5 = vcmask 720560  }
  0x7e   :  { %379 = vrot.lane.b32.xlu0 %v453_v3, %s579_s0  ;;  %40 = vst.msk [vmem:[#allocation0] sm:$0x1] %vm39_vm6, %v38_v5   ;;  %vm135_vm6 = vcmask 704160  }
  0x80   :  { %v44_v6 = vpop.permute.xlu0 %43   ;;  %v50_v7 = vpop.permute.xlu1 %49  }
  0x81   :  { %46 = vst.msk [vmem:[#allocation0] sm:$0x1] %vm45_vm7, %v44_v6   ;;  %vm141_vm7 = vcmask 687760  }
  0x82   :  { %52 = vst.msk [vmem:[#allocation0] sm:$0x1] %vm51_vm8, %v50_v7   ;;  %vm147_vm8 = vcmask 671360  }
  0x84   :  { %v56_v8 = vpop.permute.xlu0 %55   ;;  %v62_v9 = vpop.permute.xlu1 %61  }
  0x85   :  { %58 = vst.msk [vmem:[#allocation0] sm:$0x1] %vm57_vm9, %v56_v8   ;;  %vm153_vm9 = vcmask 654960  }
  0x86   :  { %64 = vst.msk [vmem:[#allocation0] sm:$0x1] %vm63_vm10, %v62_v9   ;;  %vm159_vm10 = vcmask 638560  }
  0x88   :  { %v68_v10 = vpop.permute.xlu0 %67   ;;  %v74_v11 = vpop.permute.xlu1 %73  }
  0x89   :  { %70 = vst.msk [vmem:[#allocation0] sm:$0x1] %vm69_vm11, %v68_v10   ;;  %vm165_vm11 = vcmask 622160  }
  0x8a   :  { %76 = vst.msk [vmem:[#allocation0] sm:$0x1] %vm75_vm12, %v74_v11   ;;  %vm171_vm12 = vcmask 605760  }
  0x8c   :  { %v80_v12 = vpop.permute.xlu0 %79   ;;  %v86_v13 = vpop.permute.xlu1 %85  }
  0x8d   :  { %82 = vst.msk [vmem:[#allocation0] sm:$0x1] %vm81_vm13, %v80_v12   ;;  %vm177_vm13 = vcmask 589360  }
  0x8e   :  { %88 = vst.msk [vmem:[#allocation0] sm:$0x1] %vm87_vm14, %v86_v13   ;;  %vm183_vm14 = vcmask 572960  }
  0x90   :  { %v92_v14 = vpop.permute.xlu0 %91   ;;  %v98_v15 = vpop.permute.xlu1 %97  }
  0x91   :  { %94 = vst.msk [vmem:[#allocation0] sm:$0x1] %vm93_vm15, %v92_v14   ;;  %vm189_vm15 = vcmask 556560  }
  0x92   :  { %100 = vst.msk [vmem:[#allocation0] sm:$0x1] %vm99_vm0, %v98_v15   ;;  %vm195_vm0 = vcmask 540160  }
  0x94   :  { %v104_v16 = vpop.permute.xlu0 %103   ;;  %v110_v17 = vpop.permute.xlu1 %109  }
  0x95   :  { %106 = vst.msk [vmem:[#allocation0] sm:$0x1] %vm105_vm1, %v104_v16   ;;  %vm201_vm1 = vcmask 523760  }
  0x96   :  { %112 = vst.msk [vmem:[#allocation0] sm:$0x1] %vm111_vm2, %v110_v17   ;;  %vm207_vm2 = vcmask 507360  }
  0x98   :  { %v116_v18 = vpop.permute.xlu0 %115   ;;  %v122_v19 = vpop.permute.xlu1 %121  }
  0x99   :  { %118 = vst.msk [vmem:[#allocation0] sm:$0x1] %vm117_vm3, %v116_v18   ;;  %vm213_vm3 = vcmask 490960  }
  0x9a   :  { %124 = vst.msk [vmem:[#allocation0] sm:$0x1] %vm123_vm4, %v122_v19   ;;  %vm219_vm4 = vcmask 474560  }
  0x9c   :  { %v128_v20 = vpop.permute.xlu0 %127   ;;  %v134_v21 = vpop.permute.xlu1 %133  }
  0x9d   :  { %130 = vst.msk [vmem:[#allocation0] sm:$0x1] %vm129_vm5, %v128_v20   ;;  %vm225_vm5 = vcmask 458160  }
  0x9e   :  { %136 = vst.msk [vmem:[#allocation0] sm:$0x1] %vm135_vm6, %v134_v21   ;;  %vm231_vm6 = vcmask 441760  }
  0xa0   :  { %v140_v22 = vpop.permute.xlu0 %139   ;;  %v146_v23 = vpop.permute.xlu1 %145  }
  0xa1   :  { %142 = vst.msk [vmem:[#allocation0] sm:$0x1] %vm141_vm7, %v140_v22   ;;  %vm237_vm7 = vcmask 425360  }
  0xa2   :  { %148 = vst.msk [vmem:[#allocation0] sm:$0x1] %vm147_vm8, %v146_v23   ;;  %vm243_vm8 = vcmask 408960  }
  0xa4   :  { %v152_v24 = vpop.permute.xlu0 %151   ;;  %v158_v25 = vpop.permute.xlu1 %157  }
  0xa5   :  { %154 = vst.msk [vmem:[#allocation0] sm:$0x1] %vm153_vm9, %v152_v24   ;;  %vm249_vm9 = vcmask 392560  }
  0xa6   :  { %160 = vst.msk [vmem:[#allocation0] sm:$0x1] %vm159_vm10, %v158_v25   ;;  %vm255_vm10 = vcmask 376160  }
  0xa8   :  { %v164_v26 = vpop.permute.xlu0 %163   ;;  %v170_v27 = vpop.permute.xlu1 %169  }
  0xa9   :  { %166 = vst.msk [vmem:[#allocation0] sm:$0x1] %vm165_vm11, %v164_v26   ;;  %vm261_vm11 = vcmask 359760  }
  0xaa   :  { %172 = vst.msk [vmem:[#allocation0] sm:$0x1] %vm171_vm12, %v170_v27   ;;  %vm267_vm12 = vcmask 343360  }
  0xac   :  { %v176_v28 = vpop.permute.xlu0 %175   ;;  %v182_v29 = vpop.permute.xlu1 %181  }
  0xad   :  { %178 = vst.msk [vmem:[#allocation0] sm:$0x1] %vm177_vm13, %v176_v28   ;;  %vm273_vm13 = vcmask 326960  }
  0xae   :  { %184 = vst.msk [vmem:[#allocation0] sm:$0x1] %vm183_vm14, %v182_v29   ;;  %vm279_vm14 = vcmask 310560  }
  0xb0   :  { %v188_v30 = vpop.permute.xlu0 %187   ;;  %v194_v31 = vpop.permute.xlu1 %193  }
  0xb1   :  { %190 = vst.msk [vmem:[#allocation0] sm:$0x1] %vm189_vm15, %v188_v30   ;;  %vm285_vm15 = vcmask 294160  }
  0xb2   :  { %196 = vst.msk [vmem:[#allocation0] sm:$0x1] %vm195_vm0, %v194_v31   ;;  %vm291_vm0 = vcmask 277760  }
  0xb4   :  { %v200_v32 = vpop.permute.xlu0 %199   ;;  %v206_v33 = vpop.permute.xlu1 %205  }
  0xb5   :  { %202 = vst.msk [vmem:[#allocation0] sm:$0x1] %vm201_vm1, %v200_v32   ;;  %vm297_vm1 = vcmask 261360  }
  0xb6   :  { %208 = vst.msk [vmem:[#allocation0] sm:$0x1] %vm207_vm2, %v206_v33   ;;  %vm303_vm2 = vcmask 244960  }
  0xb8   :  { %v212_v34 = vpop.permute.xlu0 %211   ;;  %v218_v35 = vpop.permute.xlu1 %217  }
  0xb9   :  { %214 = vst.msk [vmem:[#allocation0] sm:$0x1] %vm213_vm3, %v212_v34   ;;  %vm309_vm3 = vcmask 228560  }
  0xba   :  { %220 = vst.msk [vmem:[#allocation0] sm:$0x1] %vm219_vm4, %v218_v35   ;;  %vm315_vm4 = vcmask 212160  }
  0xbc   :  { %v224_v36 = vpop.permute.xlu0 %223   ;;  %v230_v37 = vpop.permute.xlu1 %229  }
  0xbd   :  { %226 = vst.msk [vmem:[#allocation0] sm:$0x1] %vm225_vm5, %v224_v36   ;;  %vm321_vm5 = vcmask 195760  }
  0xbe   :  { %232 = vst.msk [vmem:[#allocation0] sm:$0x1] %vm231_vm6, %v230_v37   ;;  %vm327_vm6 = vcmask 179360  }
  0xc0   :  { %v236_v38 = vpop.permute.xlu0 %235   ;;  %v242_v39 = vpop.permute.xlu1 %241  }
  0xc1   :  { %238 = vst.msk [vmem:[#allocation0] sm:$0x1] %vm237_vm7, %v236_v38   ;;  %vm333_vm7 = vcmask 162960  }
  0xc2   :  { %244 = vst.msk [vmem:[#allocation0] sm:$0x1] %vm243_vm8, %v242_v39   ;;  %vm339_vm8 = vcmask 146560  }
  0xc4   :  { %v248_v40 = vpop.permute.xlu0 %247   ;;  %v254_v41 = vpop.permute.xlu1 %253  }
  0xc5   :  { %250 = vst.msk [vmem:[#allocation0] sm:$0x1] %vm249_vm9, %v248_v40   ;;  %vm345_vm9 = vcmask 130160  }
  0xc6   :  { %256 = vst.msk [vmem:[#allocation0] sm:$0x1] %vm255_vm10, %v254_v41   ;;  %vm351_vm10 = vcmask 113760  }
  0xc8   :  { %v260_v42 = vpop.permute.xlu0 %259   ;;  %v266_v43 = vpop.permute.xlu1 %265  }
  0xc9   :  { %262 = vst.msk [vmem:[#allocation0] sm:$0x1] %vm261_vm11, %v260_v42   ;;  %vm357_vm11 = vcmask 97360  }
  0xca   :  { %268 = vst.msk [vmem:[#allocation0] sm:$0x1] %vm267_vm12, %v266_v43   ;;  %vm363_vm12 = vcmask 80960  }
  0xcc   :  { %v272_v44 = vpop.permute.xlu0 %271   ;;  %v278_v45 = vpop.permute.xlu1 %277  }
  0xcd   :  { %274 = vst.msk [vmem:[#allocation0] sm:$0x1] %vm273_vm13, %v272_v44   ;;  %vm369_vm13 = vcmask 64560  }
  0xce   :  { %280 = vst.msk [vmem:[#allocation0] sm:$0x1] %vm279_vm14, %v278_v45   ;;  %vm375_vm14 = vcmask 48160  }
  0xd0   :  { %v284_v46 = vpop.permute.xlu0 %283   ;;  %v290_v47 = vpop.permute.xlu1 %289  }
  0xd1   :  { %286 = vst.msk [vmem:[#allocation0] sm:$0x1] %vm285_vm15, %v284_v46   ;;  %vm381_vm15 = vcmask 31760  }
  0xd2   :  { %292 = vst.msk [vmem:[#allocation0] sm:$0x1] %vm291_vm0, %v290_v47  }
  0xd4   :  { %v296_v48 = vpop.permute.xlu0 %295   ;;  %v302_v49 = vpop.permute.xlu1 %301  }
  0xd5   :  { %298 = vst.msk [vmem:[#allocation0] sm:$0x1] %vm297_vm1, %v296_v48  }
  0xd6   :  { %304 = vst.msk [vmem:[#allocation0] sm:$0x1] %vm303_vm2, %v302_v49  }
  0xd8   :  { %v308_v50 = vpop.permute.xlu0 %307   ;;  %v314_v51 = vpop.permute.xlu1 %313  }
  0xd9   :  { %310 = vst.msk [vmem:[#allocation0] sm:$0x1] %vm309_vm3, %v308_v50  }
  0xda   :  { %316 = vst.msk [vmem:[#allocation0] sm:$0x1] %vm315_vm4, %v314_v51  }
  0xdc   :  { %v320_v52 = vpop.permute.xlu0 %319   ;;  %v326_v53 = vpop.permute.xlu1 %325  }
  0xdd   :  { %322 = vst.msk [vmem:[#allocation0] sm:$0x1] %vm321_vm5, %v320_v52  }
  0xde   :  { %328 = vst.msk [vmem:[#allocation0] sm:$0x1] %vm327_vm6, %v326_v53  }
  0xe0   :  { %v332_v54 = vpop.permute.xlu0 %331   ;;  %v338_v55 = vpop.permute.xlu1 %337  }
  0xe1   :  { %334 = vst.msk [vmem:[#allocation0] sm:$0x1] %vm333_vm7, %v332_v54  }
  0xe2   :  { %340 = vst.msk [vmem:[#allocation0] sm:$0x1] %vm339_vm8, %v338_v55  }
  0xe4   :  { %v344_v56 = vpop.permute.xlu0 %343   ;;  %v350_v57 = vpop.permute.xlu1 %349  }
  0xe5   :  { %346 = vst.msk [vmem:[#allocation0] sm:$0x1] %vm345_vm9, %v344_v56  }
  0xe6   :  { %352 = vst.msk [vmem:[#allocation0] sm:$0x1] %vm351_vm10, %v350_v57  }
  0xe8   :  { %v356_v58 = vpop.permute.xlu0 %355   ;;  %v362_v59 = vpop.permute.xlu1 %361  }
  0xe9   :  { %358 = vst.msk [vmem:[#allocation0] sm:$0x1] %vm357_vm11, %v356_v58  }
  0xea   :  { %364 = vst.msk [vmem:[#allocation0] sm:$0x1] %vm363_vm12, %v362_v59  }
  0xec   :  { %v368_v60 = vpop.permute.xlu0 %367   ;;  %v374_v61 = vpop.permute.xlu1 %373  }
  0xed   :  { %370 = vst.msk [vmem:[#allocation0] sm:$0x1] %vm369_vm13, %v368_v60  }
  0xee   :  { %376 = vst.msk [vmem:[#allocation0] sm:$0x1] %vm375_vm14, %v374_v61  }
  0xf0   :  { %v380_v62 = vpop.permute.xlu0 %379  }
  0xf1   :  { %382 = vst.msk [vmem:[#allocation0] sm:$0x1] %vm381_vm15, %v380_v62  }
  0xf8   :  { %v387_v63 = vld [vmem:[#allocation0] sm:$0x1] }
  0xf9   :  { %390 = vst [vmem:[%s786_s1] sm:$0x1] %v387_v63 }

// kernel: linear_pallas.1
= control target key start
LH: loop header
LB: loop body
LE: loop exit
PB: predicated region body
PF: predicated region fallthrough
CT: control target
= control target key end

     0   :  { %s70_s20 = smov 127   ;;  %s71_s21 = smov 1   ;;  %s120_s0 = inlined_call_operand.vmem [shape: f32[8,128], index: 0, kind: input, shape index: {}]   ;;  %s121_s1 = inlined_call_operand.vmem [shape: f32[1,128], index: 1, kind: input, shape index: {}]   ;;  %s122_s2 = inlined_call_operand.vmem [shape: f32[1,128], index: 2, kind: input, shape index: {}]   ;;  %s123_s3 = inlined_call_operand.vmem [shape: f32[1,128], index: 3, kind: input, shape index: {}]   ;;  %s124_s4 = inlined_call_operand.vmem [shape: f32[1,128], index: 4, kind: input, shape index: {}]   ;;  %s125_s5 = inlined_call_operand.vmem [shape: f32[8,128], index: 5, kind: output, shape index: {}]  }
   0x1   :  { %v20_v0 = vld [vmem:[%s120_s0] sm:$0xff] }
   0x2   :  { %21 = vrot.lane.b32.xlu0 %v20_v0, %s70_s20  ;;  %v64_v1 = vld [vmem:[%s121_s1] ss:$0 sm:$0xff] }
   0x3   :  { %v65_v2 = vld [vmem:[%s122_s2] ss:$0 sm:$0xff]  ;;  %v32_v4 = vmul.f32 %v64_v1, %v20_v0 }
   0x4   :  { %v66_v6 = vld [vmem:[%s123_s3] ss:$0 sm:$0xff] }
   0x5   :  { %v67_v10 = vld [vmem:[%s124_s4] ss:$0 sm:$0xff] }
   0x6   :  { %23 = vrot.lane.b32.xlu0 %v20_v0, %s71_s21 }
  0x74   :  { %v22_v3 = vpop.permute.xlu0 %21 }
  0x75   :  { %v40_v5 = vmul.f32 %v65_v2, %v22_v3 }
  0x77   :  { %v41_v8 = vadd.f32 %v40_v5, %v32_v4 }
  0x78   :  { %v24_v7 = vpop.permute.xlu0 %23 }
  0x79   :  { %v49_v9 = vmul.f32 %v66_v6, %v24_v7 }
  0x7b   :  { %v50_v11 = vadd.f32 %v49_v9, %v41_v8 }
  0x7d   :  { %v58_v12 = vadd.f32 %v67_v10, %v50_v11 }
  0x7f   :  { %59 = vst [vmem:[%s125_s5] sm:$0xff] %v58_v12 }

</bundles_post_ra>
